<compile_context>
chip_gen: v7x
topology: tpu7x:2x2x1
jax: 0.10.0
libtpu: 0.0.40
codegen_flags: <defaults>
</compile_context>

<pallas_src>
import functools

import numpy as np
import jax
import jax.numpy as jnp
from jax.experimental import pallas as pl
from jax.experimental.pallas import tpu as pltpu

_HMT = np.array([[1, 1, 1, 1],
                 [1, -1, 1, -1],
                 [1, 1, -1, -1],
                 [1, -1, -1, 1]], dtype=np.float32)
_HMT2 = _HMT[[1, 0, 2, 3], :]
_HMT3 = _HMT[[3, 1, 2, 0], :]
# TODO(synk): the reference file defines _IHMT self-referentially (`_IHMT = _IHMT[1:3, :]`,
# a NameError as written). We keep the interpretation "rows 1:3 of the corresponding Hadamard
# matrix" for the 2x4 inverse transforms (same as the previously validated version).
_IHMT = _HMT[1:3, :]
_IHMT2 = _HMT2[1:3, :]
_IHMT3 = _HMT3[1:3, :]

KERNEL = 4
STRIDE = 2
_TARGET_STEP_BYTES = 8 << 20    # per-grid-step streamed-byte target (2-8 MiB sweet spot)
_VMEM_FIT_FRACTION = 0.7        # keep pipelined buffers well inside the scoped-VMEM limit


def _round_up(x, m):
    return (x + m - 1) // m * m


def _vmem_capacity_bytes():
    """Generation-aware VMEM capacity (v5e/v6e: 128 MiB, v7x: 64 MiB); conservative fallback."""
    try:
        cap = int(pltpu.get_tpu_info().vmem_capacity_bytes)
        if cap > 0:
            return cap
    except Exception:
        pass
    return 64 << 20


def _tiled_bytes(shape, dtype):
    """VMEM footprint of a block after (sublane, lane) tiling/padding."""
    itemsize = jnp.dtype(dtype).itemsize
    dims = list(shape)
    if len(dims) >= 1:
        dims[-1] = _round_up(dims[-1], 128)
    if len(dims) >= 2:
        dims[-2] = _round_up(dims[-2], 8 * max(1, 4 // itemsize))
    n = itemsize
    for d in dims:
        n *= d
    return n


# --------------------------- offline weight folding ---------------------------
def _build_keff_t(weight):
    """Fold Hadamard fwd transforms, per-group weights and 2x4 inverse transforms into one GEMM
    matrix Keff^T of shape (C_out*4, C_in*16).  Row m = o*4 + u*2 + v; column k = (p*4+q)*C_in + c
    with (p, q) = (width, height) offsets inside the 4x4 patch (torch.unfold order)."""
    c_out, c_in = weight.shape[0], weight.shape[1]
    third = c_out // 3
    groups = [
        (0, third, _HMT, _IHMT),            # forward: H    @ P @ H    (H symmetric)
        (third, 2 * third, _HMT2, _IHMT2),  # forward: H2.T @ P @ H2
        (2 * third, c_out, _HMT3, _IHMT3),  # forward: H3.T @ P @ H3
    ]
    ks = []
    for lo, hi, a_mat, ih_mat in groups:
        if hi <= lo:
            continue
        w_g = weight[lo:hi]                                   # (Cg, C_in, 4, 4)
        a = jnp.asarray(a_mat)
        ih = jnp.asarray(ih_mat)
        # KeffT[o,u,v,p,q,c] = sum_{a,b} IH[u,a] IH[v,b] A[p,a] A[q,b] W[o,c,a,b]
        k_g = jnp.einsum('ua,vb,pa,qb,ocab->ouvpqc', ih, ih, a, a, w_g)
        ks.append(k_g)
    keff = jnp.concatenate(ks, axis=0)                        # (C_out, 2, 2, 4, 4, C_in)
    return keff.reshape(c_out * 4, KERNEL * KERNEL * c_in).astype(jnp.float32)


# ------------------------------- Pallas kernel ---------------------------------
def _make_fused_kernel(c_in, n_w, s_out):
    """Fused im2col + GEMM + bias.  Per grid step (one batch item x one row block):
       xw_ref: (1, 4*C, S_in)  flattened phase-split input slab (streamed, bf16/f32)
       k_ref : (M, 16*C)       stationary folded weights (f32)
       b_ref : (M, 1)          stationary bias (f32)
       o_ref : (1, M, S_out)   lane-dense output tile
    Flat slab index s = ri*(nW+1) + ci; patch view (p, q) is the contiguous slice starting at
    (q//2)*(nW+1) + (p//2) in the phase slab (q%2, p%2)."""
    row_pitch = n_w + 1

    def kernel(xw_ref, k_ref, b_ref, o_ref):
        acc = None
        for p in range(KERNEL):            # width offset inside the 4x4 patch
            for q in range(KERNEL):        # height offset inside the 4x4 patch
                off = (q // 2) * row_pitch + (p // 2)          # static element offset
                ph = (q % 2) * 2 + (p % 2)                     # (row-parity, col-parity) phase
                sl = xw_ref[0, ph * c_in:(ph + 1) * c_in, off:off + s_out]       # (C, S_out)
                kcol = k_ref[:, (p * KERNEL + q) * c_in:(p * KERNEL + q + 1) * c_in]  # (M, C)
                part = jnp.dot(kcol, sl.astype(jnp.float32),
                               preferred_element_type=jnp.float32)
                acc = part if acc is None else acc + part
        o_ref[0] = (acc + b_ref[...]).astype(o_ref.dtype)

    return kernel


# ------------------------------- JAX wrapper ------------------------------------
def mult_layer3_forward(x, weight, bias=None, *, stream_dtype=jnp.bfloat16,
                        out_dtype=jnp.float32, row_blocks=None):
    b, c_in, ih, iw = x.shape
    c_out = weight.shape[0]
    assert ih % 2 == 0 and iw % 2 == 0, "MultLayer3 requires even spatial dims"
    n_h, n_w = ih // 2, iw // 2                       # = (H + 2 - 4)//2 + 1 for even H, W
    k_dim = c_in * KERNEL * KERNEL
    m0 = c_out * 4
    m_mult = 8 if jnp.dtype(out_dtype).itemsize == 4 else 16
    m_pad = _round_up(m0, m_mult)
    in_itemsize = jnp.dtype(stream_dtype).itemsize
    out_itemsize = jnp.dtype(out_dtype).itemsize

    # --- stationary operands: folded weights + bias (kept f32: stationary => no HBM cost) ---
    keff = _build_keff_t(weight)                                       # (m0, K)
    if bias is None:
        bias_col = jnp.zeros((m0, 1), jnp.float32)
    else:
        bias_col = jnp.repeat(bias.reshape(-1).astype(jnp.float32), 4).reshape(m0, 1)
    if m_pad != m0:
        keff = jnp.pad(keff, ((0, m_pad - m0), (0, 0)))
        bias_col = jnp.pad(bias_col, ((0, m_pad - m0), (0, 0)))

    # --- generation-aware VMEM budget & row-block (tile) selection ---
    vmem_budget = max(16 << 20, min(int(_vmem_capacity_bytes() * 0.6), 96 << 20))
    fit_budget = int(vmem_budget * _VMEM_FIT_FRACTION)
    stationary_bytes = 2 * (_tiled_bytes((m_pad, k_dim), jnp.float32)
                            + _tiled_bytes((m_pad, 1), jnp.float32))

    def _step_cost(ti_c):
        s_out_p = _round_up(ti_c * (n_w + 1), 128)
        s_in_p = _round_up(n_w + 2 + s_out_p, 128)
        in_blk = _tiled_bytes((4 * c_in, s_in_p), stream_dtype)
        out_blk = _tiled_bytes((m_pad, s_out_p), out_dtype)
        work = (_tiled_bytes((m_pad, s_out_p), jnp.float32)
                + 4 * _tiled_bytes((c_in, s_out_p), jnp.float32))
        stream = in_blk + out_blk
        vmem = 2 * (in_blk + out_blk) + stationary_bytes + work
        return stream, vmem

    # >=2 grid steps so both v7x TensorCores get work under ("parallel",).
    min_rb = 2 if (b < 2 and n_h >= 2) else 1
    if row_blocks is not None:
        n_rb = max(1, min(int(row_blocks), n_h))
    else:
        chosen, fallback = None, None
        for cand in range(min_rb, n_h + 1):
            ti_c = -(-n_h // cand)
            stream, vmem = _step_cost(ti_c)
            if vmem <= fit_budget:
                if fallback is None:
                    fallback = cand
                if stream <= _TARGET_STEP_BYTES:
                    chosen = cand
                    break
        # TODO(synk): extremely wide images would additionally need column tiling; not handled.
        n_rb = chosen if chosen is not None else (fallback if fallback is not None else n_h)
    ti = -(-n_h // n_rb)
    n_rb = -(-n_h // ti)
    n_h_pad = n_rb * ti
    grid_n = b * n_rb
    s_out_pad = _round_up(ti * (n_w + 1), 128)          # lane-dense output tile width
    s_in_pad = _round_up(n_w + 2 + s_out_pad, 128)      # covers max slice offset + length

    # --- input prep (one cheap XLA pass): pad, split into (row,col) parity phases, window rows ---
    xs = x.astype(stream_dtype)                         # bf16 streaming halves dominant HBM bytes
    xp = jnp.pad(xs, ((0, 0), (0, 0), (1, 1), (1, 1)))                  # (B, C, H+2, W+2)
    xph = xp.reshape(b, c_in, n_h + 1, 2, n_w + 1, 2)                   # rows=(ri,pr), cols=(ci,pc)
    xph = jnp.transpose(xph, (0, 3, 5, 1, 2, 4))                        # (B, pr, pc, C, nH+1, nW+1)
    xph = xph.reshape(b, 4 * c_in, n_h + 1, n_w + 1)                    # phase-major channel axis
    if n_h_pad > n_h:
        xph = jnp.pad(xph, ((0, 0), (0, 0), (0, n_h_pad - n_h), (0, 0)))
    # one-row halo per row block (patch rows 2i..2i+3 reach one phase-row past the block)
    slabs = [xph[:, :, rb * ti:rb * ti + ti + 1, :] for rb in range(n_rb)]
    xw = jnp.stack(slabs, axis=1)                                       # (B, n_rb, 4C, TI+1, nW+1)
    xw = xw.reshape(b, n_rb, 4 * c_in, (ti + 1) * (n_w + 1))
    xw = jnp.pad(xw, ((0, 0), (0, 0), (0, 0), (0, s_in_pad - (ti + 1) * (n_w + 1))))
    xw = xw.reshape(grid_n, 4 * c_in, s_in_pad)

    cost = pl.CostEstimate(
        flops=2 * m_pad * k_dim * s_out_pad * grid_n,
        transcendentals=0,
        bytes_accessed=(int(xw.size) * in_itemsize + int(keff.size) * 4 + int(bias_col.size) * 4
                        + grid_n * m_pad * s_out_pad * out_itemsize),
    )

    out_t = pl.pallas_call(
        _make_fused_kernel(c_in, n_w, s_out_pad),
        out_shape=jax.ShapeDtypeStruct((grid_n, m_pad, s_out_pad), out_dtype),
        grid=(grid_n,),
        in_specs=[
            pl.BlockSpec((1, 4 * c_in, s_in_pad), lambda g: (g, 0, 0)),   # streamed input slab
            pl.BlockSpec((m_pad, k_dim), lambda g: (0, 0)),               # stationary Keff^T (f32)
            pl.BlockSpec((m_pad, 1), lambda g: (0, 0)),                   # stationary bias (f32)
        ],
        out_specs=pl.BlockSpec((1, m_pad, s_out_pad), lambda g: (g, 0, 0)),
        compiler_params=pltpu.CompilerParams(
            dimension_semantics=("parallel",),
            vmem_limit_bytes=int(vmem_budget),
        ),
        cost_estimate=cost,
    )(xw, keff, bias_col)

    # --- epilogue: drop padding, un-flatten, 2x2 Hadamard-pixel interleave (one XLA transpose) ---
    # TODO(synk): a plain GEMM cannot interleave LHS-derived (u,v) with RHS-derived (i,j) output
    # indices, so this interleave stays outside the kernel; downstream consumers could take the
    # (grid, M, tile) layout directly and skip this pass.
    out = out_t[:, :m0, :ti * (n_w + 1)]
    out = out.reshape(b, n_rb, c_out, 2, 2, ti, n_w + 1)[..., :n_w]      # drop halo/garbage column
    out = jnp.transpose(out, (0, 2, 1, 5, 3, 6, 4))                      # (b, o, rb, i, u, j, v)
    out = out.reshape(b, c_out, 2 * n_h_pad, iw)[:, :, :ih, :]           # drop padded rows
    return out


# -------------------- Pure-JAX reference (step-by-step, mirrors PyTorch) --------------------
def _patches_ref(x):
    b, c, ih, iw = x.shape
    n_h = (ih + 2 - KERNEL) // STRIDE + 1
    n_w = (iw + 2 - KERNEL) // STRIDE + 1
    xp = jnp.pad(x, ((0, 0), (0, 0), (1, 1), (1, 1)))
    p_blocks = []
    for p in range(KERNEL):
        q_blocks = []
        for q in range(KERNEL):
            q_blocks.append(xp[:, :,
                               q:q + STRIDE * (n_h - 1) + 1:STRIDE,
                               p:p + STRIDE * (n_w - 1) + 1:STRIDE])     # (B,C,nH,nW)
        p_blocks.append(jnp.stack(q_blocks, axis=-1))                    # (B,C,nH,nW,q)
    patches = jnp.stack(p_blocks, axis=-2)                               # (B,C,nH,nW,p,q)
    return patches, n_h, n_w


def mult_layer3_reference(x, weight, bias=None):
    b, c_in, ih, iw = x.shape
    c_out = weight.shape[0]
    patches, n_h, n_w = _patches_ref(x)
    h1 = jnp.asarray(_HMT); h2 = jnp.asarray(_HMT2); h3 = jnp.asarray(_HMT3)
    i1 = jnp.asarray(_IHMT); i2 = jnp.asarray(_IHMT2); i3 = jnp.asarray(_IHMT3)
    t1 = jnp.einsum('ap,bcijpq,qe->bcijae', h1, patches, h1)   # H    @ P @ H
    t2 = jnp.einsum('pa,bcijpq,qe->bcijae', h2, patches, h2)   # H2.T @ P @ H2
    t3 = jnp.einsum('pa,bcijpq,qe->bcijae', h3, patches, h3)   # H3.T @ P @ H3
    third = c_out // 3
    outs = []
    for o in range(c_out):
        if o < third:
            t, inv = t1, i1
        elif o < 2 * third:
            t, inv = t2, i2
        else:
            t, inv = t3, i3
        u = jnp.einsum('bcijae,cae->bijae', t, weight[o])
        v = jnp.einsum('ua,bijae,ve->bijuv', inv, u, inv)
        outs.append(v)
    hm = jnp.stack(outs, axis=1)                               # (B, C_out, nH, nW, 2, 2)
    out = jnp.transpose(hm, (0, 1, 2, 4, 3, 5)).reshape(b, c_out, ih, iw)
    if bias is not None:
        out = out + bias
    return out


if __name__ == "__main__":
    key = jax.random.PRNGKey(0)
    k_x, k_w, k_b = jax.random.split(key, 3)
    B, C_IN, C_OUT, IH, IW = 2, 4, 6, 16, 16

    x = jax.random.normal(k_x, (B, C_IN, IH, IW), dtype=jnp.float32)
    weight = 0.1 * jax.random.normal(k_w, (C_OUT, C_IN, KERNEL, KERNEL), dtype=jnp.float32)
    bias = 0.1 * jax.random.normal(k_b, (1, C_OUT, 1, 1), dtype=jnp.float32)

    ref = mult_layer3_reference(x, weight, bias)

    # 1) f32 streaming: exact semantics, tight tolerance.
    fwd_f32 = jax.jit(functools.partial(mult_layer3_forward, stream_dtype=jnp.float32))
    out_f32 = jax.block_until_ready(fwd_f32(x, weight, bias))
    assert out_f32.shape == (B, C_OUT, IH, IW), out_f32.shape
    np.testing.assert_allclose(np.asarray(out_f32), np.asarray(ref), rtol=2e-3, atol=2e-3)

    # 2) default path: bf16-streamed input (half HBM bytes), f32 weights + f32 accumulation.
    out_bf16 = jax.block_until_ready(jax.jit(mult_layer3_forward)(x, weight, bias))
    np.testing.assert_allclose(np.asarray(out_bf16), np.asarray(ref), rtol=3e-2, atol=3e-2)

    # 3) forced row-blocking (exercises halo windows + row padding), f32 for a tight check.
    fwd_rb = jax.jit(functools.partial(mult_layer3_forward,
                                       stream_dtype=jnp.float32, row_blocks=3))
    out_rb = jax.block_until_ready(fwd_rb(x, weight, bias))
    np.testing.assert_allclose(np.asarray(out_rb), np.asarray(ref), rtol=2e-3, atol=2e-3)

    print("KERNEL_OK")
</pallas_src>

<mosaic_0001>
module attributes {stable_mosaic.version = 11 : i64} {
  func.func @kernel(%arg0: i32, %arg1: memref<1x16x256xf32, #tpu.memory_space<vmem>>, %arg2: memref<24x64xf32, #tpu.memory_space<vmem>>, %arg3: memref<24x1xf32, #tpu.memory_space<vmem>>, %arg4: memref<1x24x128xf32, #tpu.memory_space<vmem>>) attributes {dimension_semantics = [#tpu.dimension_semantics<parallel>], iteration_bounds = array<i64: 2>, scalar_prefetch = 0 : i64, scratch_operands = 0 : i64, tpu.core_type = #tpu.core_type<tc>, window_params = [{transform_indices = @transform_0, window_bounds = array<i64: 1, 16, 256>}, {pipeline_mode = #tpu.pipeline_mode<synchronous>, transform_indices = @transform_1, window_bounds = array<i64: 24, 64>}, {pipeline_mode = #tpu.pipeline_mode<synchronous>, transform_indices = @transform_2, window_bounds = array<i64: 24, 1>}, {transform_indices = @transform_3, window_bounds = array<i64: 1, 24, 128>}]} {
    %c0 = arith.constant 0 : index
    %c0_0 = arith.constant 0 : index
    %c0_1 = arith.constant 0 : index
    %0 = vector.load %arg1[%c0, %c0_0, %c0_1] : memref<1x16x256xf32, #tpu.memory_space<vmem>>, vector<1x4x128xf32>
    %1 = vector.shape_cast %0 : vector<1x4x128xf32> to vector<4x128xf32>
    %c0_2 = arith.constant 0 : index
    %c0_3 = arith.constant 0 : index
    %2 = vector.load %arg2[%c0_2, %c0_3] : memref<24x64xf32, #tpu.memory_space<vmem>>, vector<24x4xf32>
    %cst = arith.constant dense<0.000000e+00> : vector<24x128xf32>
    %3 = tpu.matmul %2, %1, %cst {dimension_numbers = #tpu.dot_dimension_numbers<[1], [0], [0], [1], [0, 0, 1, 1], [], []>} : vector<24x4xf32>, vector<4x128xf32>, vector<24x128xf32> -> vector<24x128xf32>
    %c0_4 = arith.constant 0 : index
    %c8 = arith.constant 8 : index
    %c0_5 = arith.constant 0 : index
    %4 = vector.load %arg1[%c0_4, %c8, %c0_5] : memref<1x16x256xf32, #tpu.memory_space<vmem>>, vector<1x4x128xf32>
    %5 = vector.shape_cast %4 : vector<1x4x128xf32> to vector<4x128xf32>
    %c0_6 = arith.constant 0 : index
    %c4 = arith.constant 4 : index
    %6 = vector.load %arg2[%c0_6, %c4] : memref<24x64xf32, #tpu.memory_space<vmem>>, vector<24x4xf32>
    %cst_7 = arith.constant dense<0.000000e+00> : vector<24x128xf32>
    %7 = tpu.matmul %6, %5, %cst_7 {dimension_numbers = #tpu.dot_dimension_numbers<[1], [0], [0], [1], [0, 0, 1, 1], [], []>} : vector<24x4xf32>, vector<4x128xf32>, vector<24x128xf32> -> vector<24x128xf32>
    %8 = arith.addf %3, %7 : vector<24x128xf32>
    %c0_8 = arith.constant 0 : index
    %c0_9 = arith.constant 0 : index
    %c9 = arith.constant 9 : index
    %9 = vector.load %arg1[%c0_8, %c0_9, %c9] : memref<1x16x256xf32, #tpu.memory_space<vmem>>, vector<1x4x128xf32>
    %10 = vector.shape_cast %9 : vector<1x4x128xf32> to vector<4x128xf32>
    %c0_10 = arith.constant 0 : index
    %c8_11 = arith.constant 8 : index
    %11 = vector.load %arg2[%c0_10, %c8_11] : memref<24x64xf32, #tpu.memory_space<vmem>>, vector<24x4xf32>
    %cst_12 = arith.constant dense<0.000000e+00> : vector<24x128xf32>
    %12 = tpu.matmul %11, %10, %cst_12 {dimension_numbers = #tpu.dot_dimension_numbers<[1], [0], [0], [1], [0, 0, 1, 1], [], []>} : vector<24x4xf32>, vector<4x128xf32>, vector<24x128xf32> -> vector<24x128xf32>
    %13 = arith.addf %8, %12 : vector<24x128xf32>
    %c0_13 = arith.constant 0 : index
    %c8_14 = arith.constant 8 : index
    %c9_15 = arith.constant 9 : index
    %14 = vector.load %arg1[%c0_13, %c8_14, %c9_15] : memref<1x16x256xf32, #tpu.memory_space<vmem>>, vector<1x4x128xf32>
    %15 = vector.shape_cast %14 : vector<1x4x128xf32> to vector<4x128xf32>
    %c0_16 = arith.constant 0 : index
    %c12 = arith.constant 12 : index
    %16 = vector.load %arg2[%c0_16, %c12] : memref<24x64xf32, #tpu.memory_space<vmem>>, vector<24x4xf32>
    %cst_17 = arith.constant dense<0.000000e+00> : vector<24x128xf32>
    %17 = tpu.matmul %16, %15, %cst_17 {dimension_numbers = #tpu.dot_dimension_numbers<[1], [0], [0], [1], [0, 0, 1, 1], [], []>} : vector<24x4xf32>, vector<4x128xf32>, vector<24x128xf32> -> vector<24x128xf32>
    %18 = arith.addf %13, %17 : vector<24x128xf32>
    %c0_18 = arith.constant 0 : index
    %c4_19 = arith.constant 4 : index
    %c0_20 = arith.constant 0 : index
    %19 = vector.load %arg1[%c0_18, %c4_19, %c0_20] : memref<1x16x256xf32, #tpu.memory_space<vmem>>, vector<1x4x128xf32>
    %20 = vector.shape_cast %19 : vector<1x4x128xf32> to vector<4x128xf32>
    %c0_21 = arith.constant 0 : index
    %c16 = arith.constant 16 : index
    %21 = vector.load %arg2[%c0_21, %c16] : memref<24x64xf32, #tpu.memory_space<vmem>>, vector<24x4xf32>
    %cst_22 = arith.constant dense<0.000000e+00> : vector<24x128xf32>
    %22 = tpu.matmul %21, %20, %cst_22 {dimension_numbers = #tpu.dot_dimension_numbers<[1], [0], [0], [1], [0, 0, 1, 1], [], []>} : vector<24x4xf32>, vector<4x128xf32>, vector<24x128xf32> -> vector<24x128xf32>
    %23 = arith.addf %18, %22 : vector<24x128xf32>
    %c0_23 = arith.constant 0 : index
    %c12_24 = arith.constant 12 : index
    %c0_25 = arith.constant 0 : index
    %24 = vector.load %arg1[%c0_23, %c12_24, %c0_25] : memref<1x16x256xf32, #tpu.memory_space<vmem>>, vector<1x4x128xf32>
    %25 = vector.shape_cast %24 : vector<1x4x128xf32> to vector<4x128xf32>
    %c0_26 = arith.constant 0 : index
    %c20 = arith.constant 20 : index
    %26 = vector.load %arg2[%c0_26, %c20] : memref<24x64xf32, #tpu.memory_space<vmem>>, vector<24x4xf32>
    %cst_27 = arith.constant dense<0.000000e+00> : vector<24x128xf32>
    %27 = tpu.matmul %26, %25, %cst_27 {dimension_numbers = #tpu.dot_dimension_numbers<[1], [0], [0], [1], [0, 0, 1, 1], [], []>} : vector<24x4xf32>, vector<4x128xf32>, vector<24x128xf32> -> vector<24x128xf32>
    %28 = arith.addf %23, %27 : vector<24x128xf32>
    %c0_28 = arith.constant 0 : index
    %c4_29 = arith.constant 4 : index
    %c9_30 = arith.constant 9 : index
    %29 = vector.load %arg1[%c0_28, %c4_29, %c9_30] : memref<1x16x256xf32, #tpu.memory_space<vmem>>, vector<1x4x128xf32>
    %30 = vector.shape_cast %29 : vector<1x4x128xf32> to vector<4x128xf32>
    %c0_31 = arith.constant 0 : index
    %c24 = arith.constant 24 : index
    %31 = vector.load %arg2[%c0_31, %c24] : memref<24x64xf32, #tpu.memory_space<vmem>>, vector<24x4xf32>
    %cst_32 = arith.constant dense<0.000000e+00> : vector<24x128xf32>
    %32 = tpu.matmul %31, %30, %cst_32 {dimension_numbers = #tpu.dot_dimension_numbers<[1], [0], [0], [1], [0, 0, 1, 1], [], []>} : vector<24x4xf32>, vector<4x128xf32>, vector<24x128xf32> -> vector<24x128xf32>
    %33 = arith.addf %28, %32 : vector<24x128xf32>
    %c0_33 = arith.constant 0 : index
    %c12_34 = arith.constant 12 : index
    %c9_35 = arith.constant 9 : index
    %34 = vector.load %arg1[%c0_33, %c12_34, %c9_35] : memref<1x16x256xf32, #tpu.memory_space<vmem>>, vector<1x4x128xf32>
    %35 = vector.shape_cast %34 : vector<1x4x128xf32> to vector<4x128xf32>
    %c0_36 = arith.constant 0 : index
    %c28 = arith.constant 28 : index
    %36 = vector.load %arg2[%c0_36, %c28] : memref<24x64xf32, #tpu.memory_space<vmem>>, vector<24x4xf32>
    %cst_37 = arith.constant dense<0.000000e+00> : vector<24x128xf32>
    %37 = tpu.matmul %36, %35, %cst_37 {dimension_numbers = #tpu.dot_dimension_numbers<[1], [0], [0], [1], [0, 0, 1, 1], [], []>} : vector<24x4xf32>, vector<4x128xf32>, vector<24x128xf32> -> vector<24x128xf32>
    %38 = arith.addf %33, %37 : vector<24x128xf32>
    %c0_38 = arith.constant 0 : index
    %c0_39 = arith.constant 0 : index
    %c1 = arith.constant 1 : index
    %39 = vector.load %arg1[%c0_38, %c0_39, %c1] : memref<1x16x256xf32, #tpu.memory_space<vmem>>, vector<1x4x128xf32>
    %40 = vector.shape_cast %39 : vector<1x4x128xf32> to vector<4x128xf32>
    %c0_40 = arith.constant 0 : index
    %c32 = arith.constant 32 : index
    %41 = vector.load %arg2[%c0_40, %c32] : memref<24x64xf32, #tpu.memory_space<vmem>>, vector<24x4xf32>
    %cst_41 = arith.constant dense<0.000000e+00> : vector<24x128xf32>
    %42 = tpu.matmul %41, %40, %cst_41 {dimension_numbers = #tpu.dot_dimension_numbers<[1], [0], [0], [1], [0, 0, 1, 1], [], []>} : vector<24x4xf32>, vector<4x128xf32>, vector<24x128xf32> -> vector<24x128xf32>
    %43 = arith.addf %38, %42 : vector<24x128xf32>
    %c0_42 = arith.constant 0 : index
    %c8_43 = arith.constant 8 : index
    %c1_44 = arith.constant 1 : index
    %44 = vector.load %arg1[%c0_42, %c8_43, %c1_44] : memref<1x16x256xf32, #tpu.memory_space<vmem>>, vector<1x4x128xf32>
    %45 = vector.shape_cast %44 : vector<1x4x128xf32> to vector<4x128xf32>
    %c0_45 = arith.constant 0 : index
    %c36 = arith.constant 36 : index
    %46 = vector.load %arg2[%c0_45, %c36] : memref<24x64xf32, #tpu.memory_space<vmem>>, vector<24x4xf32>
    %cst_46 = arith.constant dense<0.000000e+00> : vector<24x128xf32>
    %47 = tpu.matmul %46, %45, %cst_46 {dimension_numbers = #tpu.dot_dimension_numbers<[1], [0], [0], [1], [0, 0, 1, 1], [], []>} : vector<24x4xf32>, vector<4x128xf32>, vector<24x128xf32> -> vector<24x128xf32>
    %48 = arith.addf %43, %47 : vector<24x128xf32>
    %c0_47 = arith.constant 0 : index
    %c0_48 = arith.constant 0 : index
    %c10 = arith.constant 10 : index
    %49 = vector.load %arg1[%c0_47, %c0_48, %c10] : memref<1x16x256xf32, #tpu.memory_space<vmem>>, vector<1x4x128xf32>
    %50 = vector.shape_cast %49 : vector<1x4x128xf32> to vector<4x128xf32>
    %c0_49 = arith.constant 0 : index
    %c40 = arith.constant 40 : index
    %51 = vector.load %arg2[%c0_49, %c40] : memref<24x64xf32, #tpu.memory_space<vmem>>, vector<24x4xf32>
    %cst_50 = arith.constant dense<0.000000e+00> : vector<24x128xf32>
    %52 = tpu.matmul %51, %50, %cst_50 {dimension_numbers = #tpu.dot_dimension_numbers<[1], [0], [0], [1], [0, 0, 1, 1], [], []>} : vector<24x4xf32>, vector<4x128xf32>, vector<24x128xf32> -> vector<24x128xf32>
    %53 = arith.addf %48, %52 : vector<24x128xf32>
    %c0_51 = arith.constant 0 : index
    %c8_52 = arith.constant 8 : index
    %c10_53 = arith.constant 10 : index
    %54 = vector.load %arg1[%c0_51, %c8_52, %c10_53] : memref<1x16x256xf32, #tpu.memory_space<vmem>>, vector<1x4x128xf32>
    %55 = vector.shape_cast %54 : vector<1x4x128xf32> to vector<4x128xf32>
    %c0_54 = arith.constant 0 : index
    %c44 = arith.constant 44 : index
    %56 = vector.load %arg2[%c0_54, %c44] : memref<24x64xf32, #tpu.memory_space<vmem>>, vector<24x4xf32>
    %cst_55 = arith.constant dense<0.000000e+00> : vector<24x128xf32>
    %57 = tpu.matmul %56, %55, %cst_55 {dimension_numbers = #tpu.dot_dimension_numbers<[1], [0], [0], [1], [0, 0, 1, 1], [], []>} : vector<24x4xf32>, vector<4x128xf32>, vector<24x128xf32> -> vector<24x128xf32>
    %58 = arith.addf %53, %57 : vector<24x128xf32>
    %c0_56 = arith.constant 0 : index
    %c4_57 = arith.constant 4 : index
    %c1_58 = arith.constant 1 : index
    %59 = vector.load %arg1[%c0_56, %c4_57, %c1_58] : memref<1x16x256xf32, #tpu.memory_space<vmem>>, vector<1x4x128xf32>
    %60 = vector.shape_cast %59 : vector<1x4x128xf32> to vector<4x128xf32>
    %c0_59 = arith.constant 0 : index
    %c48 = arith.constant 48 : index
    %61 = vector.load %arg2[%c0_59, %c48] : memref<24x64xf32, #tpu.memory_space<vmem>>, vector<24x4xf32>
    %cst_60 = arith.constant dense<0.000000e+00> : vector<24x128xf32>
    %62 = tpu.matmul %61, %60, %cst_60 {dimension_numbers = #tpu.dot_dimension_numbers<[1], [0], [0], [1], [0, 0, 1, 1], [], []>} : vector<24x4xf32>, vector<4x128xf32>, vector<24x128xf32> -> vector<24x128xf32>
    %63 = arith.addf %58, %62 : vector<24x128xf32>
    %c0_61 = arith.constant 0 : index
    %c12_62 = arith.constant 12 : index
    %c1_63 = arith.constant 1 : index
    %64 = vector.load %arg1[%c0_61, %c12_62, %c1_63] : memref<1x16x256xf32, #tpu.memory_space<vmem>>, vector<1x4x128xf32>
    %65 = vector.shape_cast %64 : vector<1x4x128xf32> to vector<4x128xf32>
    %c0_64 = arith.constant 0 : index
    %c52 = arith.constant 52 : index
    %66 = vector.load %arg2[%c0_64, %c52] : memref<24x64xf32, #tpu.memory_space<vmem>>, vector<24x4xf32>
    %cst_65 = arith.constant dense<0.000000e+00> : vector<24x128xf32>
    %67 = tpu.matmul %66, %65, %cst_65 {dimension_numbers = #tpu.dot_dimension_numbers<[1], [0], [0], [1], [0, 0, 1, 1], [], []>} : vector<24x4xf32>, vector<4x128xf32>, vector<24x128xf32> -> vector<24x128xf32>
    %68 = arith.addf %63, %67 : vector<24x128xf32>
    %c0_66 = arith.constant 0 : index
    %c4_67 = arith.constant 4 : index
    %c10_68 = arith.constant 10 : index
    %69 = vector.load %arg1[%c0_66, %c4_67, %c10_68] : memref<1x16x256xf32, #tpu.memory_space<vmem>>, vector<1x4x128xf32>
    %70 = vector.shape_cast %69 : vector<1x4x128xf32> to vector<4x128xf32>
    %c0_69 = arith.constant 0 : index
    %c56 = arith.constant 56 : index
    %71 = vector.load %arg2[%c0_69, %c56] : memref<24x64xf32, #tpu.memory_space<vmem>>, vector<24x4xf32>
    %cst_70 = arith.constant dense<0.000000e+00> : vector<24x128xf32>
    %72 = tpu.matmul %71, %70, %cst_70 {dimension_numbers = #tpu.dot_dimension_numbers<[1], [0], [0], [1], [0, 0, 1, 1], [], []>} : vector<24x4xf32>, vector<4x128xf32>, vector<24x128xf32> -> vector<24x128xf32>
    %73 = arith.addf %68, %72 : vector<24x128xf32>
    %c0_71 = arith.constant 0 : index
    %c12_72 = arith.constant 12 : index
    %c10_73 = arith.constant 10 : index
    %74 = vector.load %arg1[%c0_71, %c12_72, %c10_73] : memref<1x16x256xf32, #tpu.memory_space<vmem>>, vector<1x4x128xf32>
    %75 = vector.shape_cast %74 : vector<1x4x128xf32> to vector<4x128xf32>
    %c0_74 = arith.constant 0 : index
    %c60 = arith.constant 60 : index
    %76 = vector.load %arg2[%c0_74, %c60] : memref<24x64xf32, #tpu.memory_space<vmem>>, vector<24x4xf32>
    %cst_75 = arith.constant dense<0.000000e+00> : vector<24x128xf32>
    %77 = tpu.matmul %76, %75, %cst_75 {dimension_numbers = #tpu.dot_dimension_numbers<[1], [0], [0], [1], [0, 0, 1, 1], [], []>} : vector<24x4xf32>, vector<4x128xf32>, vector<24x128xf32> -> vector<24x128xf32>
    %78 = arith.addf %73, %77 : vector<24x128xf32>
    %c0_76 = arith.constant 0 : index
    %c0_77 = arith.constant 0 : index
    %79 = vector.load %arg3[%c0_76, %c0_77] : memref<24x1xf32, #tpu.memory_space<vmem>>, vector<24x1xf32>
    %80 = vector.broadcast %79 : vector<24x1xf32> to vector<24x128xf32>
    %81 = arith.addf %78, %80 : vector<24x128xf32>
    %c0_78 = arith.constant 0 : index
    %c0_79 = arith.constant 0 : index
    %c0_80 = arith.constant 0 : index
    %82 = vector.load %arg4[%c0_78, %c0_79, %c0_80] : memref<1x24x128xf32, #tpu.memory_space<vmem>>, vector<1x24x128xf32>
    %83 = vector.shape_cast %82 : vector<1x24x128xf32> to vector<24x128xf32>
    %84 = vector.shape_cast %81 : vector<24x128xf32> to vector<1x24x128xf32>
    tpu.vector_store %arg4[%c0_78, %c0_79, %c0_80], %84 {strides = array<i32>} : memref<1x24x128xf32, #tpu.memory_space<vmem>>, vector<1x24x128xf32>,
    return
  }
  func.func @transform_0(%arg0: i32) -> (i32, i32, i32) {
    %c0_i32 = arith.constant 0 : i32
    %c0_i32_0 = arith.constant 0 : i32
    %c0_i32_1 = arith.constant 0 : i32
    return %arg0, %c0_i32, %c0_i32_0 : i32, i32, i32
  }
  func.func @transform_1(%arg0: i32) -> (i32, i32) {
    %c0_i32 = arith.constant 0 : i32
    %c0_i32_0 = arith.constant 0 : i32
    %c0_i32_1 = arith.constant 0 : i32
    return %c0_i32, %c0_i32_0 : i32, i32
  }
  func.func @transform_2(%arg0: i32) -> (i32, i32) {
    %c0_i32 = arith.constant 0 : i32
    %c0_i32_0 = arith.constant 0 : i32
    %c0_i32_1 = arith.constant 0 : i32
    return %c0_i32, %c0_i32_0 : i32, i32
  }
  func.func @transform_3(%arg0: i32) -> (i32, i32, i32) {
    %c0_i32 = arith.constant 0 : i32
    %c0_i32_0 = arith.constant 0 : i32
    %c0_i32_1 = arith.constant 0 : i32
    return %arg0, %c0_i32, %c0_i32_0 : i32, i32, i32
  }
}

</mosaic_0001>

<bundles_post_ra>
// kernel: mult_layer3_forward.1
= control target key start
LH: loop header
LB: loop body
LE: loop exit
PB: predicated region body
PF: predicated region fallthrough
CT: control target
= control target key end

     0   :  { %s2287_s12 = smov 0   ;;  %s2639_s0 = inlined_call_operand.vmem [shape: f32[2,16,256], index: 0, kind: input, shape index: {}]   ;;  %s2640_s1 = inlined_call_operand.vmem [shape: f32[24,64], index: 1, kind: input, shape index: {}]   ;;  %s2641_s2 = inlined_call_operand.vmem [shape: f32[24,1], index: 2, kind: input, shape index: {}]   ;;  %s2642_s3 = inlined_call_operand.vmem [shape: f32[2,24,128], index: 3, kind: output, shape index: {}]  }
   0x1 LB: > { %s1891_s13 = sadd.s32 4294967295, %s2244_s12   ;;  %p1895_p0 = scmp.ge.s32.totalorder %s2244_s12, 1  ;;  %s2244_s12 = sphi %s2287_s12, %s13_s12  }
   0x2   : > { %p137_p1 = scmp.lt.s32.totalorder %s2244_s12, 3 }
   0x4   : > { %p138_p2 = pnand %p1895_p0, %p137_p1 }
   0x5   : > { %v2298_v0 = vld [vmem:[%s2640_s1] sm:$0xff] (!%p138_p2)  ;;  %v2303_v1 = vld [vmem:[%s2640_s1 + $0x10] sm:$0xff] (!%p138_p2)  ;;  %p161_p3 = scmp.lt.s32.totalorder (!%p138_p2), %s1891_s13, 1  ;;  %s2246_s18 = smov (!%p138_p2), 124   ;;  %v2310_v2 = vld [vmem:[%s2640_s1 + $0x8] sm:$0xff] (!%p138_p2)  ;;  %v2247_v3 = vmov (!%p138_p2), 0.0  }
   0x6   : > { %141 = sbr.rel (%p138_p2) target bundleno = 479 (0x1df), region = 32  ;;  %179 = vrot.lane.b32.xlu0 (!%p138_p2), %v2298_v0, %s2246_s18  ;;  %183 = vrot.lane.b32.xlu1 (!%p138_p2), %v2303_v1, %s2246_s18  ;;  %vm2248_vm0 = vmmov (!%p138_p2), 0   ;;  %s2249_s25 = smov (!%p138_p2), 119   ;;  %vm192_vm1 = vcmask (!%p138_p2), 1043456   ;;  %vm185_vm2 = vcmask (!%p138_p2), 31744   ;;  %vm379_vm3 = vcmask (!%p138_p2), 973824  }
   0x7   : > { %2030 = vmatprep.subr.mxu0 (!%p138_p2), %v2247_v3  ;;  %2041 = vmatprep.subr.mxu1 (!%p138_p2), %v2247_v3  ;;  %s2250_s26 = smov (!%p138_p2), 120   ;;  %s2251_s27 = smov (!%p138_p2), 116   ;;  %vm1004_vm4 = vcmask (!%p138_p2), 1039360   ;;  %vm1209_vm5 = vcmask (!%p138_p2), 965632  }
   0x8   : > { %2032 = vmatprep.mubr.msk.f32.mxu0 (!%p138_p2), %vm2248_vm0, %v2247_v3  ;;  %2043 = vmatprep.mubr.msk.f32.mxu1 (!%p138_p2), %vm2248_vm0, %v2247_v3  ;;  %s2252_s28 = smov (!%p138_p2), 112   ;;  %s2253_s29 = smov (!%p138_p2), 108  }
   0x9   : > { %s2254_s30 = smov (!%p138_p2), 104   ;;  %s2255_s4 = smov (!%p138_p2), 100  }
   0xa   : > { %181 = vrot.lane.b32.xlu0 (!%p138_p2), %v2310_v2, %s2246_s18  ;;  %s2256_s5 = smov (!%p138_p2), 127   ;;  %s2257_s6 = smov (!%p138_p2), 96  }
   0xb   : > { %s2258_s7 = smov (!%p138_p2), 92   ;;  %s2259_s8 = smov (!%p138_p2), 118  }
   0xc   : > { %s2260_s9 = smov (!%p138_p2), 88   ;;  %s2261_s10 = smov (!%p138_p2), 84  }
   0xd   : > { %s2644_s13 = smov (!%p161_p3, %s1891_s13), 1  ;;  %s2262_s11 = smov 80  }
   0xe   : > { %s1965_s21 = sshll.u32 %s2644_s13, 5  ;;  %s2263_s14 = smov 76  }
   0xf   : > { %s2325_s24 = scalar_lea.vmem %s2639_s0, %s1965_s21  ;;  %s2264_s15 = smov 72  }
  0x10   : > { %v2328_v4 = vld [vmem:[%s2325_s24] sm:$0xf]  ;;  %v2331_v5 = vld [vmem:[%s2325_s24 + $0x8] sm:$0xf]  ;;  %v175_v6 = vld [vmem:[%s2325_s24 + $0x10] sm:$0xf] }
  0x11   : > { %375 = vrot.lane.b32.xlu1 %v2328_v4, %s2249_s25  ;;  %377 = vrot.lane.b32.xlu0 %v2331_v5, %s2249_s25  ;;  %v2339_v7 = vld [vmem:[%s2325_s24 + $0x10] sm:$0xf]  ;;  %v171_v8 = vld [vmem:[%s2325_s24] sm:$0xf]  ;;  %s2265_s16 = smov 68   ;;  %s2206_s23 = smul.u32 24, %s2644_s13 }
  0x12   : > { %2031 = vmatpush3.msk.msra.mxu0 %vm192_vm1, %v175_v6  ;;  %2042 = vmatpush3.msk.msra.mxu1 %vm192_vm1, %v171_v8  ;;  %v2346_v9 = vld [vmem:[%s2325_s24 + $0x18] sm:$0xf]  ;;  %v778_v10 = vld [vmem:[%s2325_s24] sm:$0xf0]  ;;  %v779_v11 = vld [vmem:[%s2325_s24 + $0x8] sm:$0xf0] }
  0x13   : > { %2044 = vmatmul.mubr.msk.f32.vlgmr.msra.gmra.mrb[0].mxu1 %vm185_vm2, %v2298_v0  ;;  %2052 = vmatprep.subr.mxu0 %v2247_v3  ;;  %v788_v12 = vrot.slane %v778_v10, 4  ;;  %v789_v13 = vrot.slane %v779_v11, 4  ;;  %v886_v14 = vld [vmem:[%s2325_s24 + $0x10] sm:$0xf0]  ;;  %v887_v15 = vld [vmem:[%s2325_s24 + $0x18] sm:$0xf0] }
  0x14   : > { %2046 = vmatprep.mubr.msk.f32.mxu1 %vm2248_vm0, %v2247_v3  ;;  %2063 = vmatprep.subr.mxu1 %v2247_v3  ;;  %v2383_v16 = vrot.slane %v886_v14, 4  ;;  %v2386_v17 = vrot.slane %v887_v15, 4  ;;  %v578_v23 = vld [vmem:[%s2325_s24] sm:$0xf0]  ;;  %v678_v28 = vld [vmem:[%s2325_s24 + $0x10] sm:$0xf0] }
  0x15   : > { %367 = vrot.lane.b32.xlu1 %v2298_v0, %s2250_s26  ;;  %482 = vrot.lane.b32.xlu0 %v2339_v7, %s2249_s25  ;;  %v586_v26 = vrot.slane %v578_v23, 4  ;;  %v686_v31 = vrot.slane %v678_v28, 4  ;;  %v1812_v10 = vld [vmem:[%s2641_s2] sm:$0xff]  ;;  %v1813_v14 = vld [vmem:[%s2641_s2 + $0x8] sm:$0xff] }
  0x17   : > { %2047 = vmatmul.mubr.msk.f32.gmra.mrb[2].mxu1 %vm185_vm2, %v2310_v2 }
  0x18   : > { %2049 = vmatprep.mubr.msk.f32.mxu1 %vm2248_vm0, %v2247_v3 }
  0x19   : > { %484 = vrot.lane.b32.xlu1 %v2346_v9, %s2249_s25  ;;  %474 = vrot.lane.b32.xlu0 %v2298_v0, %s2251_s27 }
  0x1b   : > { %2050 = vmatmul.mubr.msk.f32.gmra.mrb[4].mxu1 %vm185_vm2, %v2303_v1 }
  0x1c   : > { %2065 = vmatprep.mubr.msk.f32.mxu1 %vm2248_vm0, %v2247_v3 }
  0x1d   : > { %369 = vrot.lane.b32.xlu1 %v2310_v2, %s2250_s26  ;;  %476 = vrot.lane.b32.xlu0 %v2310_v2, %s2251_s27 }
  0x21   : > { %371 = vrot.lane.b32.xlu1 %v2303_v1, %s2250_s26  ;;  %478 = vrot.lane.b32.xlu0 %v2303_v1, %s2251_s27  ;;  %s170_s26 = scalar_lea.vmem %s2642_s3, %s2206_s23 }
  0x25   : > { %579 = vrot.lane.b32.xlu1 %v2298_v0, %s2252_s28  ;;  %679 = vrot.lane.b32.xlu0 %v2298_v0, %s2253_s29 }
  0x29   : > { %581 = vrot.lane.b32.xlu1 %v2310_v2, %s2252_s28  ;;  %681 = vrot.lane.b32.xlu0 %v2310_v2, %s2253_s29 }
  0x2d   : > { %583 = vrot.lane.b32.xlu1 %v2303_v1, %s2252_s28  ;;  %683 = vrot.lane.b32.xlu0 %v2303_v1, %s2253_s29 }
  0x31   : > { %790 = vrot.lane.b32.xlu1 %v788_v12, %s2249_s25  ;;  %792 = vrot.lane.b32.xlu0 %v789_v13, %s2249_s25 }
  0x35   : > { %780 = vrot.lane.b32.xlu1 %v2298_v0, %s2254_s30  ;;  %898 = vrot.lane.b32.xlu0 %v2383_v16, %s2249_s25 }
  0x39   : > { %900 = vrot.lane.b32.xlu1 %v2386_v17, %s2249_s25  ;;  %888 = vrot.lane.b32.xlu0 %v2298_v0, %s2255_s4 }
  0x3d   : > { %782 = vrot.lane.b32.xlu1 %v2310_v2, %s2254_s30  ;;  %890 = vrot.lane.b32.xlu0 %v2310_v2, %s2255_s4 }
  0x41   : > { %784 = vrot.lane.b32.xlu1 %v2303_v1, %s2254_s30  ;;  %892 = vrot.lane.b32.xlu0 %v2303_v1, %s2255_s4 }
  0x45   : > { %1000 = vrot.lane.b32.xlu1 %v2328_v4, %s2256_s5  ;;  %1002 = vrot.lane.b32.xlu0 %v2331_v5, %s2256_s5 }
  0x49   : > { %994 = vrot.lane.b32.xlu1 %v2298_v0, %s2257_s6  ;;  %1103 = vrot.lane.b32.xlu0 %v2339_v7, %s2256_s5 }
  0x4d   : > { %1105 = vrot.lane.b32.xlu1 %v2346_v9, %s2256_s5  ;;  %1097 = vrot.lane.b32.xlu0 %v2298_v0, %s2258_s7 }
  0x51   : > { %996 = vrot.lane.b32.xlu1 %v2310_v2, %s2257_s6  ;;  %1099 = vrot.lane.b32.xlu0 %v2310_v2, %s2258_s7 }
  0x55   : > { %998 = vrot.lane.b32.xlu1 %v2303_v1, %s2257_s6  ;;  %1101 = vrot.lane.b32.xlu0 %v2303_v1, %s2258_s7 }
  0x59   : > { %1205 = vrot.lane.b32.xlu1 %v2328_v4, %s2259_s8  ;;  %1207 = vrot.lane.b32.xlu0 %v2331_v5, %s2259_s8 }
  0x5d   : > { %1199 = vrot.lane.b32.xlu1 %v2298_v0, %s2260_s9  ;;  %1308 = vrot.lane.b32.xlu0 %v2339_v7, %s2259_s8 }
  0x61   : > { %1310 = vrot.lane.b32.xlu1 %v2346_v9, %s2259_s8  ;;  %1302 = vrot.lane.b32.xlu0 %v2298_v0, %s2261_s10  ;;  %v2266_v9 = vmov 0  }
  0x62   : > { %2236 = vset.pattern.permute.xlu1 %v2266_v9  ;;  %2237 = vset.pattern.permute.xlu0 %v2266_v9 }
  0x65   : > { %1201 = vrot.lane.b32.xlu1 %v2310_v2, %s2260_s9  ;;  %1304 = vrot.lane.b32.xlu0 %v2310_v2, %s2261_s10 }
  0x69   : > { %1203 = vrot.lane.b32.xlu1 %v2303_v1, %s2260_s9  ;;  %1306 = vrot.lane.b32.xlu0 %v2303_v1, %s2261_s10 }
  0x6d   : > { %1410 = vrot.lane.b32.xlu1 %v788_v12, %s2256_s5  ;;  %1412 = vrot.lane.b32.xlu0 %v789_v13, %s2256_s5 }
  0x71   : > { %1404 = vrot.lane.b32.xlu1 %v2298_v0, %s2262_s11  ;;  %1512 = vrot.lane.b32.xlu0 %v2383_v16, %s2256_s5 }
  0x75   : > { %1514 = vrot.lane.b32.xlu1 %v2386_v17, %s2256_s5  ;;  %1506 = vrot.lane.b32.xlu0 %v2298_v0, %s2263_s14 }
  0x78   : > { %v180_v18 = vpop.permute.xlu0 %179  ;;  %v184_v19 = vpop.permute.xlu1 %183 }
  0x79   : > { %1406 = vrot.lane.b32.xlu1 %v2310_v2, %s2262_s11  ;;  %1508 = vrot.lane.b32.xlu0 %v2310_v2, %s2263_s14 }
  0x7a   : > { %2033 = vmatmul.mubr.msk.f32.vlgmr.msra.gmra.mrb[0].mxu0 %vm185_vm2, %v180_v18 }
  0x7b   : > { %2035 = vmatprep.mubr.msk.f32.mxu0 %vm2248_vm0, %v2247_v3 }
  0x7c   : > { %v182_v20 = vpop.permute.xlu0 %181 }
  0x7d   : > { %1408 = vrot.lane.b32.xlu1 %v2303_v1, %s2262_s11  ;;  %1510 = vrot.lane.b32.xlu0 %v2303_v1, %s2263_s14 }
  0x7e   : > { %2036 = vmatmul.mubr.msk.f32.gmra.mrb[2].mxu0 %vm185_vm2, %v182_v20 }
  0x7f   : > { %2038 = vmatprep.mubr.msk.f32.mxu0 %vm2248_vm0, %v2247_v3 }
  0x81   : > { %1614 = vrot.lane.b32.xlu1 %v788_v12, %s2259_s8  ;;  %1616 = vrot.lane.b32.xlu0 %v789_v13, %s2259_s8 }
  0x82   : > { %2039 = vmatmul.mubr.msk.f32.gmra.mrb[4].mxu0 %vm185_vm2, %v184_v19 }
  0x83   : > { %v376_v21 = vpop.permute.xlu1 %375  ;;  %v378_v22 = vpop.permute.xlu0 %377  ;;  %2054 = vmatprep.mubr.msk.f32.mxu0 %vm2248_vm0, %v2247_v3 }
  0x84   : > { %v380_v24 = vsel %vm379_vm3, %v376_v21, %v378_v22 }
  0x85   : > { %1608 = vrot.lane.b32.xlu1 %v2298_v0, %s2264_s15  ;;  %1716 = vrot.lane.b32.xlu0 %v2383_v16, %s2259_s8  ;;  %v1814_v16 = vld [vmem:[%s2641_s2 + $0x10] sm:$0xff] }
  0x86   : > { %2053 = vmatpush3.msk.msra.mxu0 %vm192_vm1, %v380_v24 }
  0x87   : > { %v368_v25 = vpop.permute.xlu1 %367  ;;  %2074 = vmatprep.subr.mxu0 %v2247_v3  ;;  %v483_v27 = vpop.permute.xlu0 %482 }
  0x88   : > { %2055 = vmatmul.mubr.msk.f32.vlgmr.msra.gmra.mrb[6].mxu0 %vm185_vm2, %v368_v25 }
  0x89   : > { %1718 = vrot.lane.b32.xlu1 %v2386_v17, %s2259_s8  ;;  %1710 = vrot.lane.b32.xlu0 %v2298_v0, %s2265_s16 }
  0x8a   : > { %2057 = vmatprep.mubr.msk.f32.mxu0 %vm2248_vm0, %v2247_v3  ;;  %2075 = vmatpush3.msk.msra.mxu0 %vm192_vm1, %v586_v26 }
  0x8b   : > { %v485_v29 = vpop.permute.xlu1 %484  ;;  %v475_v32 = vpop.permute.xlu0 %474  ;;  %2096 = vmatprep.subr.mxu0 %v2247_v3 }
  0x8c   : > { %v486_v30 = vsel %vm379_vm3, %v483_v27, %v485_v29 }
  0x8d   : > { %1610 = vrot.lane.b32.xlu1 %v2310_v2, %s2264_s15  ;;  %2064 = vmatpush3.msk.msra.mxu1 %vm192_vm1, %v486_v30 }
  0x8e   : > { %2066 = vmatmul.mubr.msk.f32.vlgmr.msra.gmra.mrb[6].mxu1 %vm185_vm2, %v475_v32  ;;  %2085 = vmatprep.subr.mxu1 %v2247_v3 }
  0x8f   : > { %1712 = vrot.lane.b32.xlu0 %v2310_v2, %s2265_s16  ;;  %v370_v33 = vpop.permute.xlu1 %369  ;;  %2068 = vmatprep.mubr.msk.f32.mxu1 %vm2248_vm0, %v2247_v3  ;;  %v477_v34 = vpop.permute.xlu0 %476 }
  0x90   : > { %2058 = vmatmul.mubr.msk.f32.gmra.mrb[8].mxu0 %vm185_vm2, %v370_v33  ;;  %2086 = vmatpush3.msk.msra.mxu1 %vm192_vm1, %v686_v31 }
  0x91   : > { %1612 = vrot.lane.b32.xlu1 %v2303_v1, %s2264_s15  ;;  %2060 = vmatprep.mubr.msk.f32.mxu0 %vm2248_vm0, %v2247_v3 }
  0x92   : > { %2069 = vmatmul.mubr.msk.f32.gmra.mrb[8].mxu1 %vm185_vm2, %v477_v34  ;;  %2107 = vmatprep.subr.mxu1 %v2247_v3 }
  0x93   : > { %1714 = vrot.lane.b32.xlu0 %v2303_v1, %s2265_s16  ;;  %v372_v35 = vpop.permute.xlu1 %371  ;;  %2071 = vmatprep.mubr.msk.f32.mxu1 %vm2248_vm0, %v2247_v3  ;;  %v479_v36 = vpop.permute.xlu0 %478 }
  0x94   : > { %2061 = vmatmul.mubr.msk.f32.gmra.mrb[10].mxu0 %vm185_vm2, %v372_v35 }
  0x95   : > { %2076 = vmatprep.mubr.msk.f32.mxu0 %vm2248_vm0, %v2247_v3  ;;  %1817 = vperm.xlu1 %2236, %v1812_v10  }
  0x96   : > { %2072 = vmatmul.mubr.msk.f32.gmra.mrb[10].mxu1 %vm185_vm2, %v479_v36 }
  0x97   : > { %v580_v37 = vpop.permute.xlu1 %579  ;;  %2087 = vmatprep.mubr.msk.f32.mxu1 %vm2248_vm0, %v2247_v3  ;;  %v680_v38 = vpop.permute.xlu0 %679  ;;  %1822 = vperm.xlu0 %2237, %v1813_v14  }
  0x98   : > { %2077 = vmatmul.mubr.msk.f32.vlgmr.msra.gmra.mrb[12].mxu0 %vm185_vm2, %v580_v37 }
  0x99   : > { %2079 = vmatprep.mubr.msk.f32.mxu0 %vm2248_vm0, %v2247_v3  ;;  %1827 = vperm.xlu1 %2236, %v1814_v16  }
  0x9a   : > { %2088 = vmatmul.mubr.msk.f32.vlgmr.msra.gmra.mrb[12].mxu1 %vm185_vm2, %v680_v38 }
  0x9b   : > { %v582_v39 = vpop.permute.xlu1 %581  ;;  %2090 = vmatprep.mubr.msk.f32.mxu1 %vm2248_vm0, %v2247_v3  ;;  %v682_v40 = vpop.permute.xlu0 %681 }
  0x9c   : > { %2080 = vmatmul.mubr.msk.f32.gmra.mrb[14].mxu0 %vm185_vm2, %v582_v39 }
  0x9d   : > { %2082 = vmatprep.mubr.msk.f32.mxu0 %vm2248_vm0, %v2247_v3 }
  0x9e   : > { %2091 = vmatmul.mubr.msk.f32.gmra.mrb[14].mxu1 %vm185_vm2, %v682_v40 }
  0x9f   : > { %v584_v41 = vpop.permute.xlu1 %583  ;;  %2093 = vmatprep.mubr.msk.f32.mxu1 %vm2248_vm0, %v2247_v3  ;;  %v684_v42 = vpop.permute.xlu0 %683 }
  0xa0   : > { %2083 = vmatmul.mubr.msk.f32.gmra.mrb[16].mxu0 %vm185_vm2, %v584_v41 }
  0xa1   : > { %2098 = vmatprep.mubr.msk.f32.mxu0 %vm2248_vm0, %v2247_v3 }
  0xa2   : > { %2094 = vmatmul.mubr.msk.f32.gmra.mrb[16].mxu1 %vm185_vm2, %v684_v42 }
  0xa3   : > { %v791_v43 = vpop.permute.xlu1 %790  ;;  %2109 = vmatprep.mubr.msk.f32.mxu1 %vm2248_vm0, %v2247_v3  ;;  %v793_v44 = vpop.permute.xlu0 %792 }
  0xa4   : > { %v794_v45 = vsel %vm379_vm3, %v791_v43, %v793_v44 }
  0xa5   : > { %2097 = vmatpush3.msk.msra.mxu0 %vm192_vm1, %v794_v45 }
  0xa6   : > { %2118 = vmatprep.subr.mxu0 %v2247_v3 }
  0xa7   : > { %v781_v46 = vpop.permute.xlu1 %780  ;;  %v899_v47 = vpop.permute.xlu0 %898 }
  0xa8   : > { %2099 = vmatmul.mubr.msk.f32.vlgmr.msra.gmra.mrb[18].mxu0 %vm185_vm2, %v781_v46 }
  0xa9   : > { %2101 = vmatprep.mubr.msk.f32.mxu0 %vm2248_vm0, %v2247_v3 }
  0xab   : > { %v901_v48 = vpop.permute.xlu1 %900  ;;  %v889_v50 = vpop.permute.xlu0 %888 }
  0xac   : > { %v902_v49 = vsel %vm379_vm3, %v899_v47, %v901_v48 }
  0xad   : > { %2108 = vmatpush3.msk.msra.mxu1 %vm192_vm1, %v902_v49 }
  0xae   : > { %2110 = vmatmul.mubr.msk.f32.vlgmr.msra.gmra.mrb[18].mxu1 %vm185_vm2, %v889_v50  ;;  %2129 = vmatprep.subr.mxu1 %v2247_v3 }
  0xaf   : > { %v783_v51 = vpop.permute.xlu1 %782  ;;  %2112 = vmatprep.mubr.msk.f32.mxu1 %vm2248_vm0, %v2247_v3  ;;  %v891_v52 = vpop.permute.xlu0 %890 }
  0xb0   : > { %2102 = vmatmul.mubr.msk.f32.gmra.mrb[20].mxu0 %vm185_vm2, %v783_v51 }
  0xb1   : > { %2104 = vmatprep.mubr.msk.f32.mxu0 %vm2248_vm0, %v2247_v3 }
  0xb2   : > { %2113 = vmatmul.mubr.msk.f32.gmra.mrb[20].mxu1 %vm185_vm2, %v891_v52 }
  0xb3   : > { %v785_v53 = vpop.permute.xlu1 %784  ;;  %2115 = vmatprep.mubr.msk.f32.mxu1 %vm2248_vm0, %v2247_v3  ;;  %v893_v54 = vpop.permute.xlu0 %892 }
  0xb4   : > { %2105 = vmatmul.mubr.msk.f32.gmra.mrb[22].mxu0 %vm185_vm2, %v785_v53 }
  0xb5   : > { %2120 = vmatprep.mubr.msk.f32.mxu0 %vm2248_vm0, %v2247_v3 }
  0xb6   : > { %2116 = vmatmul.mubr.msk.f32.gmra.mrb[22].mxu1 %vm185_vm2, %v893_v54 }
  0xb7   : > { %v1001_v55 = vpop.permute.xlu1 %1000  ;;  %2131 = vmatprep.mubr.msk.f32.mxu1 %vm2248_vm0, %v2247_v3  ;;  %v1003_v56 = vpop.permute.xlu0 %1002 }
  0xb8   : > { %v1005_v57 = vsel %vm1004_vm4, %v1001_v55, %v1003_v56 }
  0xb9   : > { %2119 = vmatpush3.msk.msra.mxu0 %vm192_vm1, %v1005_v57 }
  0xba   : > { %2140 = vmatprep.subr.mxu0 %v2247_v3 }
  0xbb   : > { %v995_v58 = vpop.permute.xlu1 %994  ;;  %v1104_v59 = vpop.permute.xlu0 %1103 }
  0xbc   : > { %2121 = vmatmul.mubr.msk.f32.vlgmr.msra.gmra.mrb[24].mxu0 %vm185_vm2, %v995_v58 }
  0xbd   : > { %2123 = vmatprep.mubr.msk.f32.mxu0 %vm2248_vm0, %v2247_v3 }
  0xbf   : > { %v1106_v60 = vpop.permute.xlu1 %1105  ;;  %v1098_v62 = vpop.permute.xlu0 %1097 }
  0xc0   : > { %v1107_v61 = vsel %vm1004_vm4, %v1104_v59, %v1106_v60 }
  0xc1   : > { %2130 = vmatpush3.msk.msra.mxu1 %vm192_vm1, %v1107_v61 }
  0xc2   : > { %2132 = vmatmul.mubr.msk.f32.vlgmr.msra.gmra.mrb[24].mxu1 %vm185_vm2, %v1098_v62  ;;  %2151 = vmatprep.subr.mxu1 %v2247_v3 }
  0xc3   : > { %v997_v63 = vpop.permute.xlu1 %996  ;;  %2134 = vmatprep.mubr.msk.f32.mxu1 %vm2248_vm0, %v2247_v3  ;;  %v1100_v0 = vpop.permute.xlu0 %1099 }
  0xc4   : > { %2124 = vmatmul.mubr.msk.f32.gmra.mrb[26].mxu0 %vm185_vm2, %v997_v63 }
  0xc5   : > { %2126 = vmatprep.mubr.msk.f32.mxu0 %vm2248_vm0, %v2247_v3 }
  0xc6   : > { %2135 = vmatmul.mubr.msk.f32.gmra.mrb[26].mxu1 %vm185_vm2, %v1100_v0 }
  0xc7   : > { %v999_v1 = vpop.permute.xlu1 %998  ;;  %2137 = vmatprep.mubr.msk.f32.mxu1 %vm2248_vm0, %v2247_v3  ;;  %v1102_v2 = vpop.permute.xlu0 %1101 }
  0xc8   : > { %2127 = vmatmul.mubr.msk.f32.gmra.mrb[28].mxu0 %vm185_vm2, %v999_v1 }
  0xc9   : > { %2142 = vmatprep.mubr.msk.f32.mxu0 %vm2248_vm0, %v2247_v3 }
  0xca   : > { %2138 = vmatmul.mubr.msk.f32.gmra.mrb[28].mxu1 %vm185_vm2, %v1102_v2 }
  0xcb   : > { %v1206_v4 = vpop.permute.xlu1 %1205  ;;  %2153 = vmatprep.mubr.msk.f32.mxu1 %vm2248_vm0, %v2247_v3  ;;  %v1208_v5 = vpop.permute.xlu0 %1207 }
  0xcc   : > { %v1210_v6 = vsel %vm1209_vm5, %v1206_v4, %v1208_v5 }
  0xcd   : > { %2141 = vmatpush3.msk.msra.mxu0 %vm192_vm1, %v1210_v6 }
  0xce   : > { %2162 = vmatprep.subr.mxu0 %v2247_v3 }
  0xcf   : > { %v1200_v7 = vpop.permute.xlu1 %1199  ;;  %v1309_v8 = vpop.permute.xlu0 %1308 }
  0xd0   : > { %2143 = vmatmul.mubr.msk.f32.vlgmr.msra.gmra.mrb[30].mxu0 %vm185_vm2, %v1200_v7 }
  0xd1   : > { %2145 = vmatprep.mubr.msk.f32.mxu0 %vm2248_vm0, %v2247_v3 }
  0xd3   : > { %v1311_v11 = vpop.permute.xlu1 %1310  ;;  %v1303_v13 = vpop.permute.xlu0 %1302 }
  0xd4   : > { %v1312_v12 = vsel %vm1209_vm5, %v1309_v8, %v1311_v11 }
  0xd5   : > { %2152 = vmatpush3.msk.msra.mxu1 %vm192_vm1, %v1312_v12 }
  0xd6   : > { %2154 = vmatmul.mubr.msk.f32.vlgmr.msra.gmra.mrb[30].mxu1 %vm185_vm2, %v1303_v13  ;;  %2173 = vmatprep.subr.mxu1 %v2247_v3 }
  0xd7   : > { %v1202_v15 = vpop.permute.xlu1 %1201  ;;  %2156 = vmatprep.mubr.msk.f32.mxu1 %vm2248_vm0, %v2247_v3  ;;  %v1305_v17 = vpop.permute.xlu0 %1304 }
  0xd8   : > { %2146 = vmatmul.mubr.msk.f32.gmra.mrb[32].mxu0 %vm185_vm2, %v1202_v15 }
  0xd9   : > { %2148 = vmatprep.mubr.msk.f32.mxu0 %vm2248_vm0, %v2247_v3 }
  0xda   : > { %2157 = vmatmul.mubr.msk.f32.gmra.mrb[32].mxu1 %vm185_vm2, %v1305_v17 }
  0xdb   : > { %v1204_v18 = vpop.permute.xlu1 %1203  ;;  %2159 = vmatprep.mubr.msk.f32.mxu1 %vm2248_vm0, %v2247_v3  ;;  %v1307_v19 = vpop.permute.xlu0 %1306 }
  0xdc   : > { %2149 = vmatmul.mubr.msk.f32.gmra.mrb[34].mxu0 %vm185_vm2, %v1204_v18 }
  0xdd   : > { %2164 = vmatprep.mubr.msk.f32.mxu0 %vm2248_vm0, %v2247_v3 }
  0xde   : > { %2160 = vmatmul.mubr.msk.f32.gmra.mrb[34].mxu1 %vm185_vm2, %v1307_v19 }
  0xdf   : > { %v1411_v20 = vpop.permute.xlu1 %1410  ;;  %2175 = vmatprep.mubr.msk.f32.mxu1 %vm2248_vm0, %v2247_v3  ;;  %v1413_v21 = vpop.permute.xlu0 %1412 }
  0xe0   : > { %v1414_v22 = vsel %vm1004_vm4, %v1411_v20, %v1413_v21 }
  0xe1   : > { %2163 = vmatpush3.msk.msra.mxu0 %vm192_vm1, %v1414_v22 }
  0xe2   : > { %2184 = vmatprep.subr.mxu0 %v2247_v3 }
  0xe3   : > { %v1405_v23 = vpop.permute.xlu1 %1404  ;;  %v1513_v24 = vpop.permute.xlu0 %1512 }
  0xe4   : > { %2165 = vmatmul.mubr.msk.f32.vlgmr.msra.gmra.mrb[36].mxu0 %vm185_vm2, %v1405_v23 }
  0xe5   : > { %2167 = vmatprep.mubr.msk.f32.mxu0 %vm2248_vm0, %v2247_v3 }
  0xe6   : > { %v351_v28 = vpop.f32.mrb[0].mxu1 }
  0xe7   : > { %v1515_v25 = vpop.permute.xlu1 %1514  ;;  %v1507_v27 = vpop.permute.xlu0 %1506 }
  0xe8   : > { %v1516_v26 = vsel %vm1004_vm4, %v1513_v24, %v1515_v25  ;;  %v2045_v29 = vpop.f32.mrb[1].mxu1 }
  0xe9   : > { %2174 = vmatpush3.msk.msra.mxu1 %vm192_vm1, %v1516_v26 }
  0xea   : > { %2176 = vmatmul.mubr.msk.f32.vlgmr.msra.gmra.mrb[36].mxu1 %vm185_vm2, %v1507_v27  ;;  %2195 = vmatprep.subr.mxu1 %v2247_v3  ;;  %v356_v32 = vpop.f32.mrb[2].mxu1 }
  0xeb   : > { %v1407_v30 = vpop.permute.xlu1 %1406  ;;  %2178 = vmatprep.mubr.msk.f32.mxu1 %vm2248_vm0, %v2247_v3  ;;  %v1509_v31 = vpop.permute.xlu0 %1508 }
  0xec   : > { %2168 = vmatmul.mubr.msk.f32.gmra.mrb[38].mxu0 %vm185_vm2, %v1407_v30  ;;  %v2048_v33 = vpop.f32.mrb[3].mxu1 }
  0xed   : > { %2170 = vmatprep.mubr.msk.f32.mxu0 %vm2248_vm0, %v2247_v3 }
  0xee   : > { %2179 = vmatmul.mubr.msk.f32.gmra.mrb[38].mxu1 %vm185_vm2, %v1509_v31  ;;  %v361_v36 = vpop.f32.mrb[4].mxu1 }
  0xef   : > { %v1409_v34 = vpop.permute.xlu1 %1408  ;;  %2181 = vmatprep.mubr.msk.f32.mxu1 %vm2248_vm0, %v2247_v3  ;;  %v1511_v35 = vpop.permute.xlu0 %1510 }
  0xf0   : > { %2171 = vmatmul.mubr.msk.f32.gmra.mrb[40].mxu0 %vm185_vm2, %v1409_v34  ;;  %v2051_v37 = vpop.f32.mrb[5].mxu1 }
  0xf1   : > { %2186 = vmatprep.mubr.msk.f32.mxu0 %vm2248_vm0, %v2247_v3 }
  0xf2   : > { %2182 = vmatmul.mubr.msk.f32.gmra.mrb[40].mxu1 %vm185_vm2, %v1511_v35 }
  0xf3   : > { %v1615_v38 = vpop.permute.xlu1 %1614  ;;  %2197 = vmatprep.mubr.msk.f32.mxu1 %vm2248_vm0, %v2247_v3  ;;  %v1617_v39 = vpop.permute.xlu0 %1616 }
  0xf4   : > { %v1618_v40 = vsel %vm1209_vm5, %v1615_v38, %v1617_v39 }
  0xf5   : > { %2185 = vmatpush3.msk.msra.mxu0 %vm192_vm1, %v1618_v40 }
  0xf7   : > { %v1609_v41 = vpop.permute.xlu1 %1608  ;;  %v1717_v42 = vpop.permute.xlu0 %1716 }
  0xf8   : > { %2187 = vmatmul.mubr.msk.f32.vlgmr.msra.gmra.mrb[42].mxu0 %vm185_vm2, %v1609_v41 }
  0xf9   : > { %2189 = vmatprep.mubr.msk.f32.mxu0 %vm2248_vm0, %v2247_v3 }
  0xfb   : > { %v1719_v43 = vpop.permute.xlu1 %1718  ;;  %v1711_v45 = vpop.permute.xlu0 %1710 }
  0xfc   : > { %v1720_v44 = vsel %vm1209_vm5, %v1717_v42, %v1719_v43 }
  0xfd   : > { %2196 = vmatpush3.msk.msra.mxu1 %vm192_vm1, %v1720_v44 }
  0xfe   : > { %2198 = vmatmul.mubr.msk.f32.vlgmr.msra.gmra.mrb[42].mxu1 %vm185_vm2, %v1711_v45 }
  0xff   : > { %v1611_v46 = vpop.permute.xlu1 %1610  ;;  %2200 = vmatprep.mubr.msk.f32.mxu1 %vm2248_vm0, %v2247_v3 }
 0x100   : > { %2190 = vmatmul.mubr.msk.f32.gmra.mrb[44].mxu0 %vm185_vm2, %v1611_v46 }
 0x101   : > { %v1713_v47 = vpop.permute.xlu0 %1712  ;;  %2192 = vmatprep.mubr.msk.f32.mxu0 %vm2248_vm0, %v2247_v3 }
 0x102   : > { %2201 = vmatmul.mubr.msk.f32.gmra.mrb[44].mxu1 %vm185_vm2, %v1713_v47 }
 0x103   : > { %v1613_v48 = vpop.permute.xlu1 %1612  ;;  %2203 = vmatprep.mubr.msk.f32.mxu1 %vm2248_vm0, %v2247_v3 }
 0x104   : > { %2193 = vmatmul.mubr.msk.f32.gmra.mrb[46].mxu0 %vm185_vm2, %v1613_v48 }
 0x105   : > { %v1715_v49 = vpop.permute.xlu0 %1714 }
 0x106   : > { %2204 = vmatmul.mubr.msk.f32.gmra.mrb[46].mxu1 %vm185_vm2, %v1715_v49 }
 0x14d   : > { %v262_v50 = vpop.f32.mrb[0].mxu0 }
 0x14e   : > { %v2034_v51 = vpop.f32.mrb[1].mxu0  ;;  %v352_v52 = vadd.f32 %v351_v28, %v262_v50 }
 0x151   : > { %v267_v53 = vpop.f32.mrb[2].mxu0 }
 0x152   : > { %v2037_v54 = vpop.f32.mrb[3].mxu0  ;;  %v357_v55 = vadd.f32 %v356_v32, %v267_v53 }
 0x155   : > { %v272_v56 = vpop.f32.mrb[4].mxu0 }
 0x156   : > { %v362_v57 = vadd.f32 %v361_v36, %v272_v56  ;;  %v2040_v58 = vpop.f32.mrb[5].mxu0 }
 0x15b   : > { %v455_v59 = vpop.f32.mrb[6].mxu0 }
 0x15c   : > { %v469_v60 = vadd.f32 %v455_v59, %v352_v52  ;;  %v2056_v61 = vpop.f32.mrb[7].mxu0 }
 0x161   : > { %v561_v62 = vpop.f32.mrb[6].mxu1 }
 0x162   : > { %v575_v63 = vadd.f32 %v561_v62, %v469_v60  ;;  %v2067_v3 = vpop.f32.mrb[7].mxu1 }
 0x163   : > { %v460_v0 = vpop.f32.mrb[8].mxu0 }
 0x164   : > { %v470_v1 = vadd.f32 %v460_v0, %v357_v55  ;;  %v2059_v2 = vpop.f32.mrb[9].mxu0 }
 0x165   : > { %v566_v4 = vpop.f32.mrb[8].mxu1 }
 0x166   : > { %v576_v5 = vadd.f32 %v566_v4, %v470_v1  ;;  %v2070_v6 = vpop.f32.mrb[9].mxu1 }
 0x167   : > { %v465_v7 = vpop.f32.mrb[10].mxu0 }
 0x168   : > { %v471_v8 = vadd.f32 %v465_v7, %v362_v57  ;;  %v2062_v9 = vpop.f32.mrb[11].mxu0 }
 0x169   : > { %v571_v10 = vpop.f32.mrb[10].mxu1 }
 0x16a   : > { %v577_v11 = vadd.f32 %v571_v10, %v471_v8  ;;  %v2073_v12 = vpop.f32.mrb[11].mxu1 }
 0x16b   : > { %v661_v13 = vpop.f32.mrb[12].mxu0 }
 0x16c   : > { %v675_v14 = vadd.f32 %v661_v13, %v575_v63  ;;  %v2078_v15 = vpop.f32.mrb[13].mxu0 }
 0x16d   : > { %v761_v16 = vpop.f32.mrb[12].mxu1 }
 0x16e   : > { %v775_v17 = vadd.f32 %v761_v16, %v675_v14  ;;  %v2089_v18 = vpop.f32.mrb[13].mxu1 }
 0x16f   : > { %v666_v19 = vpop.f32.mrb[14].mxu0 }
 0x170   : > { %v676_v20 = vadd.f32 %v666_v19, %v576_v5  ;;  %v2081_v21 = vpop.f32.mrb[15].mxu0 }
 0x171   : > { %v766_v22 = vpop.f32.mrb[14].mxu1 }
 0x172   : > { %v776_v23 = vadd.f32 %v766_v22, %v676_v20  ;;  %v2092_v24 = vpop.f32.mrb[15].mxu1 }
 0x173   : > { %v671_v25 = vpop.f32.mrb[16].mxu0 }
 0x174   : > { %v677_v26 = vadd.f32 %v671_v25, %v577_v11  ;;  %v2084_v27 = vpop.f32.mrb[17].mxu0 }
 0x175   : > { %v771_v28 = vpop.f32.mrb[16].mxu1 }
 0x176   : > { %v777_v29 = vadd.f32 %v771_v28, %v677_v26  ;;  %v2095_v30 = vpop.f32.mrb[17].mxu1 }
 0x17b   : > { %v869_v31 = vpop.f32.mrb[18].mxu0 }
 0x17c   : > { %v883_v32 = vadd.f32 %v869_v31, %v775_v17  ;;  %v2100_v33 = vpop.f32.mrb[19].mxu0 }
 0x181   : > { %v977_v34 = vpop.f32.mrb[18].mxu1 }
 0x182   : > { %v991_v35 = vadd.f32 %v977_v34, %v883_v32  ;;  %v2111_v36 = vpop.f32.mrb[19].mxu1 }
 0x183   : > { %v874_v37 = vpop.f32.mrb[20].mxu0 }
 0x184   : > { %v884_v38 = vadd.f32 %v874_v37, %v776_v23  ;;  %v2103_v39 = vpop.f32.mrb[21].mxu0 }
 0x185   : > { %v982_v40 = vpop.f32.mrb[20].mxu1 }
 0x186   : > { %v992_v41 = vadd.f32 %v982_v40, %v884_v38  ;;  %v2114_v42 = vpop.f32.mrb[21].mxu1 }
 0x187   : > { %v879_v43 = vpop.f32.mrb[22].mxu0 }
 0x188   : > { %v885_v44 = vadd.f32 %v879_v43, %v777_v29  ;;  %v2106_v45 = vpop.f32.mrb[23].mxu0  ;;  %v1818_v43 = vpop.permute.xlu1 %1817 }
 0x189   : > { %v987_v46 = vpop.f32.mrb[22].mxu1 }
 0x18a   : > { %v993_v47 = vadd.f32 %v987_v46, %v885_v44  ;;  %v2117_v48 = vpop.f32.mrb[23].mxu1 }
 0x18f   : > { %v1080_v49 = vpop.f32.mrb[24].mxu0 }
 0x190   : > { %v1094_v50 = vadd.f32 %v1080_v49, %v991_v35  ;;  %v2122_v51 = vpop.f32.mrb[25].mxu0 }
 0x191   : > { %v1823_v51 = vpop.permute.xlu0 %1822 }
 0x195   : > { %v1182_v52 = vpop.f32.mrb[24].mxu1 }
 0x196   : > { %v1196_v53 = vadd.f32 %v1182_v52, %v1094_v50  ;;  %v2133_v54 = vpop.f32.mrb[25].mxu1 }
 0x197   : > { %v1085_v55 = vpop.f32.mrb[26].mxu0 }
 0x198   : > { %v1095_v56 = vadd.f32 %v1085_v55, %v992_v41  ;;  %v2125_v57 = vpop.f32.mrb[27].mxu0 }
 0x199   : > { %v1187_v58 = vpop.f32.mrb[26].mxu1 }
 0x19a   : > { %v1197_v59 = vadd.f32 %v1187_v58, %v1095_v56  ;;  %v2136_v60 = vpop.f32.mrb[27].mxu1 }
 0x19b   : > { %v1090_v61 = vpop.f32.mrb[28].mxu0 }
 0x19c   : > { %v1096_v62 = vadd.f32 %v1090_v61, %v993_v47  ;;  %v2128_v63 = vpop.f32.mrb[29].mxu0  ;;  %v1828_v61 = vpop.permute.xlu1 %1827 }
 0x19d   : > { %v1192_v3 = vpop.f32.mrb[28].mxu1 }
 0x19e   : > { %v1198_v0 = vadd.f32 %v1192_v3, %v1096_v62  ;;  %v2139_v1 = vpop.f32.mrb[29].mxu1 }
 0x1a3   : > { %v1285_v2 = vpop.f32.mrb[30].mxu0 }
 0x1a4   : > { %v1299_v4 = vadd.f32 %v1285_v2, %v1196_v53  ;;  %v2144_v5 = vpop.f32.mrb[31].mxu0 }
 0x1a9   : > { %v1387_v6 = vpop.f32.mrb[30].mxu1 }
 0x1aa   : > { %v1401_v7 = vadd.f32 %v1387_v6, %v1299_v4  ;;  %v2155_v8 = vpop.f32.mrb[31].mxu1 }
 0x1ab   : > { %v1290_v9 = vpop.f32.mrb[32].mxu0 }
 0x1ac   : > { %v1300_v10 = vadd.f32 %v1290_v9, %v1197_v59  ;;  %v2147_v11 = vpop.f32.mrb[33].mxu0 }
 0x1ad   : > { %v1392_v12 = vpop.f32.mrb[32].mxu1 }
 0x1ae   : > { %v1402_v13 = vadd.f32 %v1392_v12, %v1300_v10  ;;  %v2158_v14 = vpop.f32.mrb[33].mxu1 }
 0x1af   : > { %v1295_v15 = vpop.f32.mrb[34].mxu0 }
 0x1b0   : > { %v1301_v16 = vadd.f32 %v1295_v15, %v1198_v0  ;;  %v2150_v17 = vpop.f32.mrb[35].mxu0 }
 0x1b1   : > { %v1397_v18 = vpop.f32.mrb[34].mxu1 }
 0x1b2   : > { %v1403_v19 = vadd.f32 %v1397_v18, %v1301_v16  ;;  %v2161_v20 = vpop.f32.mrb[35].mxu1 }
 0x1b7   : > { %v1489_v21 = vpop.f32.mrb[36].mxu0 }
 0x1b8   : > { %v1503_v22 = vadd.f32 %v1489_v21, %v1401_v7  ;;  %v2166_v23 = vpop.f32.mrb[37].mxu0 }
 0x1bd   : > { %v1591_v24 = vpop.f32.mrb[36].mxu1 }
 0x1be   : > { %v1605_v25 = vadd.f32 %v1591_v24, %v1503_v22  ;;  %v2177_v26 = vpop.f32.mrb[37].mxu1 }
 0x1bf   : > { %v1494_v27 = vpop.f32.mrb[38].mxu0 }
 0x1c0   : > { %v1504_v28 = vadd.f32 %v1494_v27, %v1402_v13  ;;  %v2169_v29 = vpop.f32.mrb[39].mxu0 }
 0x1c1   : > { %v1596_v30 = vpop.f32.mrb[38].mxu1 }
 0x1c2   : > { %v1606_v31 = vadd.f32 %v1596_v30, %v1504_v28  ;;  %v2180_v32 = vpop.f32.mrb[39].mxu1 }
 0x1c3   : > { %v1499_v33 = vpop.f32.mrb[40].mxu0 }
 0x1c4   : > { %v1505_v34 = vadd.f32 %v1499_v33, %v1403_v19  ;;  %v2172_v35 = vpop.f32.mrb[41].mxu0 }
 0x1c5   : > { %v1601_v36 = vpop.f32.mrb[40].mxu1 }
 0x1c6   : > { %v1607_v37 = vadd.f32 %v1601_v36, %v1505_v34  ;;  %v2183_v38 = vpop.f32.mrb[41].mxu1 }
 0x1cb   : > { %v1693_v39 = vpop.f32.mrb[42].mxu0 }
 0x1cc   : > { %v1707_v40 = vadd.f32 %v1693_v39, %v1605_v25  ;;  %v2188_v41 = vpop.f32.mrb[43].mxu0 }
 0x1d1   : > { %v1795_v42 = vpop.f32.mrb[42].mxu1 }
 0x1d2   : > { %v1809_v44 = vadd.f32 %v1795_v42, %v1707_v40  ;;  %v2199_v45 = vpop.f32.mrb[43].mxu1 }
 0x1d3   : > { %v1698_v46 = vpop.f32.mrb[44].mxu0 }
 0x1d4   : > { %v1830_v47 = vadd.f32 %v1818_v43, %v1809_v44  ;;  %v1708_v48 = vadd.f32 %v1698_v46, %v1606_v31  ;;  %v2191_v49 = vpop.f32.mrb[45].mxu0 }
 0x1d5   : > { %v1800_v50 = vpop.f32.mrb[44].mxu1 }
 0x1d6   : > { %1833 = vst [vmem:[%s170_s26] sm:$0xff] %v1830_v47  ;;  %v1810_v52 = vadd.f32 %v1800_v50, %v1708_v48  ;;  %v2202_v53 = vpop.f32.mrb[45].mxu1 }
 0x1d7   : > { %v1703_v54 = vpop.f32.mrb[46].mxu0 }
 0x1d8   : > { %v1831_v55 = vadd.f32 %v1823_v51, %v1810_v52  ;;  %v1709_v56 = vadd.f32 %v1703_v54, %v1607_v37  ;;  %v2194_v57 = vpop.f32.mrb[47].mxu0 }
 0x1d9   : > { %v1805_v58 = vpop.f32.mrb[46].mxu1 }
 0x1da   : > { %1834 = vst [vmem:[%s170_s26 + $0x8] sm:$0xff] %v1831_v55  ;;  %v1811_v59 = vadd.f32 %v1805_v58, %v1709_v56  ;;  %v2205_v60 = vpop.f32.mrb[47].mxu1 }
 0x1dc   : > { %v1832_v62 = vadd.f32 %v1828_v61, %v1811_v59 }
 0x1de   : > { %1835 = vst [vmem:[%s170_s26 + $0x10] sm:$0xff] %v1832_v62 }
 0x1df PF: > { %s13_s12 = sadd.s32 1, %s2244_s12  }
 0x1e0   : > { %p10_p4 = scmp.ge.s32.totalorder %s13_s12, 4  }
 0x1e2   :  { %12 = sbr.rel (!%p10_p4) target bundleno = 1 (0x1), region = 62 }

</bundles_post_ra>
